<compile_context>
chip_gen: v7x
topology: tpu7x:2x2x1
jax: 0.10.0
libtpu: 0.0.40
codegen_flags: <defaults>
</compile_context>

<pallas_src>
import jax
import jax.numpy as jnp
from jax.experimental import pallas as pl
from jax.experimental.pallas import tpu as pltpu

INPUT_SIZE = 6
HIDDEN_SIZE = 240
OUTPUT_SIZE = 1
ALPHA = 0.01          # leaky_relu slope
TB = 256              # batch tile (lane axis); multiple of 128 and 256


def _leaky_relu(x, alpha=ALPHA):
    # matches np.maximum(alpha * x, x)
    return jnp.maximum(alpha * x, x)


def _mlp_kernel(xt_ref, w1t_ref, w2_ref, ot_ref):
    # Transposed layout: batch on the lane axis, features/hidden on sublanes.
    xt = xt_ref[...]                       # [6, TB]    f32
    w1t = w1t_ref[...]                     # [240, 6]   f32 (VMEM-resident)
    w2 = w2_ref[...]                       # [240, 1]   f32 (VMEM-resident)

    # Layer 1: MXU matmul, f32 accumulation.
    z = jnp.dot(w1t, xt, preferred_element_type=jnp.float32)   # [240, TB]
    z2 = _leaky_relu(z)                                         # VPU

    # Layer 2: [240,1] weight -> VPU lane-broadcast multiply + XLU sublane reduction
    # (avoids an MXU matmul that would use 1 of 256 output columns).
    z3 = jnp.sum(z2 * w2, axis=0, keepdims=True)                # [1, TB]
    ot_ref[...] = _leaky_relu(z3).astype(ot_ref.dtype)          # lane-dense store


def neural_network_forward(x, w1, w2, *, tb=TB):
    """Pallas forward. x: [B, 6] f32, w1: [6, 240] f32, w2: [240, 1] f32 -> [B, 1] f32."""
    B = x.shape[0]
    b_pad = pl.cdiv(B, tb) * tb

    # Wrapper-side layout plumbing (cheap XLA ops, outside the hot loop):
    # batch -> lanes, features -> sublanes; zero-pad batch to a tile multiple.
    xt = jnp.pad(x.astype(jnp.float32).T, ((0, 0), (0, b_pad - B)))   # [6, b_pad]
    w1t = w1.astype(jnp.float32).T                                    # [240, 6]
    w2 = w2.astype(jnp.float32)                                       # [240, 1]

    grid = (b_pad // tb,)
    cost = pl.CostEstimate(
        flops=2 * b_pad * HIDDEN_SIZE * (INPUT_SIZE + 1),
        transcendentals=0,
        bytes_accessed=4 * (xt.size + w1t.size + w2.size + b_pad),
    )

    out_t = pl.pallas_call(
        _mlp_kernel,
        out_shape=jax.ShapeDtypeStruct((1, b_pad), jnp.float32),
        grid=grid,
        in_specs=[
            # x tile marches along the batch (lane) axis.
            pl.BlockSpec((INPUT_SIZE, tb), lambda i: (0, i)),
            # Weights pinned: same block every step -> stay VMEM-resident.
            pl.BlockSpec((HIDDEN_SIZE, INPUT_SIZE), lambda i: (0, 0)),
            pl.BlockSpec((HIDDEN_SIZE, OUTPUT_SIZE), lambda i: (0, 0)),
        ],
        out_specs=pl.BlockSpec((1, tb), lambda i: (0, i)),
        compiler_params=pltpu.CompilerParams(
            # batch tiles are independent -> shard across v7x's 2 TensorCores
            dimension_semantics=("parallel",),
        ),
        cost_estimate=cost,
    )(xt, w1t, w2)

    # Back to the PyTorch-facing [B, 1] shape; drop batch padding.
    return out_t[0, :B].reshape(B, OUTPUT_SIZE)


def reference_forward(x, w1, w2):
    z = x @ w1
    z2 = jnp.maximum(ALPHA * z, z)
    z3 = z2 @ w2
    return jnp.maximum(ALPHA * z3, z3)


if __name__ == "__main__":
    key = jax.random.PRNGKey(0)
    kx, k1, k2 = jax.random.split(key, 3)

    B = 8  # small batch of game-state feature vectors
    x = jax.random.normal(kx, (B, INPUT_SIZE), dtype=jnp.float32)
    # deterministic stand-ins for torch.randn weights
    w1 = jax.random.normal(k1, (INPUT_SIZE, HIDDEN_SIZE), dtype=jnp.float32)
    w2 = jax.random.normal(k2, (HIDDEN_SIZE, OUTPUT_SIZE), dtype=jnp.float32)

    out = neural_network_forward(x, w1, w2)
    out = jax.block_until_ready(out)

    ref = reference_forward(x, w1, w2)
    assert out.shape == (B, OUTPUT_SIZE)
    assert jnp.allclose(out, ref, atol=1e-4, rtol=1e-4), "mismatch vs reference"

    print("KERNEL_OK")
</pallas_src>

<mosaic_0001>
module attributes {stable_mosaic.version = 11 : i64} {
  func.func @_mlp_kernel(%arg0: i32, %arg1: memref<6x256xf32, #tpu.memory_space<vmem>>, %arg2: memref<240x6xf32, #tpu.memory_space<vmem>>, %arg3: memref<240x1xf32, #tpu.memory_space<vmem>>, %arg4: memref<1x256xf32, #tpu.memory_space<vmem>>) attributes {dimension_semantics = [#tpu.dimension_semantics<parallel>], iteration_bounds = array<i64: 1>, scalar_prefetch = 0 : i64, scratch_operands = 0 : i64, tpu.core_type = #tpu.core_type<tc>, window_params = [{transform_indices = @transform_0, window_bounds = array<i64: 6, 256>}, {pipeline_mode = #tpu.pipeline_mode<synchronous>, transform_indices = @transform_1, window_bounds = array<i64: 240, 6>}, {pipeline_mode = #tpu.pipeline_mode<synchronous>, transform_indices = @transform_2, window_bounds = array<i64: 240, 1>}, {transform_indices = @transform_3, window_bounds = array<i64: 1, 256>}]} {
    %c0 = arith.constant 0 : index
    %c0_0 = arith.constant 0 : index
    %0 = vector.load %arg1[%c0, %c0_0] : memref<6x256xf32, #tpu.memory_space<vmem>>, vector<6x256xf32>
    %c0_1 = arith.constant 0 : index
    %c0_2 = arith.constant 0 : index
    %1 = vector.load %arg2[%c0_1, %c0_2] : memref<240x6xf32, #tpu.memory_space<vmem>>, vector<240x6xf32>
    %c0_3 = arith.constant 0 : index
    %c0_4 = arith.constant 0 : index
    %2 = vector.load %arg3[%c0_3, %c0_4] : memref<240x1xf32, #tpu.memory_space<vmem>>, vector<240x1xf32>
    %cst = arith.constant dense<0.000000e+00> : vector<240x256xf32>
    %3 = tpu.matmul %1, %0, %cst {dimension_numbers = #tpu.dot_dimension_numbers<[1], [0], [0], [1], [0, 0, 1, 1], [], []>} : vector<240x6xf32>, vector<6x256xf32>, vector<240x256xf32> -> vector<240x256xf32>
    %cst_5 = arith.constant 0.00999999977 : f32
    %4 = vector.broadcast %cst_5 : f32 to vector<240x256xf32>
    %5 = arith.mulf %4, %3 : vector<240x256xf32>
    %6 = arith.maximumf %5, %3 : vector<240x256xf32>
    %7 = vector.broadcast %2 : vector<240x1xf32> to vector<240x256xf32>
    %8 = arith.mulf %6, %7 : vector<240x256xf32>
    %cst_6 = arith.constant dense<0.000000e+00> : vector<256xf32>
    %9 = vector.multi_reduction <add>, %8, %cst_6 [0] : vector<240x256xf32> to vector<256xf32>
    %10 = vector.shape_cast %9 : vector<256xf32> to vector<1x256xf32>
    %cst_7 = arith.constant 0.00999999977 : f32
    %11 = vector.broadcast %cst_7 : f32 to vector<1x256xf32>
    %12 = arith.mulf %11, %10 : vector<1x256xf32>
    %13 = arith.maximumf %12, %10 : vector<1x256xf32>
    %c0_8 = arith.constant 0 : index
    %c0_9 = arith.constant 0 : index
    %14 = vector.load %arg4[%c0_8, %c0_9] : memref<1x256xf32, #tpu.memory_space<vmem>>, vector<1x256xf32>
    tpu.vector_store %arg4[%c0_8, %c0_9], %13 {strides = array<i32>} : memref<1x256xf32, #tpu.memory_space<vmem>>, vector<1x256xf32>,
    return
  }
  func.func @transform_0(%arg0: i32) -> (i32, i32) {
    %c0_i32 = arith.constant 0 : i32
    %c0_i32_0 = arith.constant 0 : i32
    return %c0_i32, %arg0 : i32, i32
  }
  func.func @transform_1(%arg0: i32) -> (i32, i32) {
    %c0_i32 = arith.constant 0 : i32
    %c0_i32_0 = arith.constant 0 : i32
    %c0_i32_1 = arith.constant 0 : i32
    return %c0_i32, %c0_i32_0 : i32, i32
  }
  func.func @transform_2(%arg0: i32) -> (i32, i32) {
    %c0_i32 = arith.constant 0 : i32
    %c0_i32_0 = arith.constant 0 : i32
    %c0_i32_1 = arith.constant 0 : i32
    return %c0_i32, %c0_i32_0 : i32, i32
  }
  func.func @transform_3(%arg0: i32) -> (i32, i32) {
    %c0_i32 = arith.constant 0 : i32
    %c0_i32_0 = arith.constant 0 : i32
    return %c0_i32, %arg0 : i32, i32
  }
}

</mosaic_0001>

<bundles_post_ra>
// kernel: tpu_custom_call.1
= control target key start
LH: loop header
LB: loop body
LE: loop exit
PB: predicated region body
PF: predicated region fallthrough
CT: control target
= control target key end

     0   :  { %vm168_vm0 = vcmask 1045504   ;;  %vm77_vm1 = vcmask 48128   ;;  %v925_v4 = vmov 0.0   ;;  %v926_v7 = vmov 0   ;;  %s1371_s0 = inlined_call_operand.vmem [shape: f32[6,256], index: 0, kind: input, shape index: {}]   ;;  %s1372_s1 = inlined_call_operand.vmem [shape: f32[240,6], index: 1, kind: input, shape index: {}]   ;;  %s1373_s2 = inlined_call_operand.vmem [shape: f32[240,1], index: 2, kind: input, shape index: {}]   ;;  %s1374_s3 = inlined_call_operand.hbm [shape: f32[1,256], index: 3, kind: output, shape index: {}]  }
   0x1   :  { %v16_v0 = vld [vmem:[%s1371_s0 + $0x8] sm:$0x3f]  ;;  %v15_v1 = vld [vmem:[%s1371_s0] sm:$0x3f]  ;;  %v32_v3 = vld [vmem:[%s1372_s1 + $0x78] sm:$0xff]  ;;  %239 = vmatprep.mubr.f32.mxu0 %v925_v4  ;;  %329 = vmatprep.mubr.f32.mxu1 %v925_v4 }
   0x2   :  { %861 = vmatprep.subr.msk.mxu0 %vm168_vm0, %v16_v0  ;;  %893 = vmatprep.subr.msk.mxu1 %vm168_vm0, %v16_v0  ;;  %v17_v2 = vld [vmem:[%s1372_s1] sm:$0xff]  ;;  %v18_v5 = vld [vmem:[%s1372_s1 + $0x8] sm:$0xff]  ;;  %v19_v8 = vld [vmem:[%s1372_s1 + $0x10] sm:$0xff] }
   0x3   :  { %862 = vmatpush1.msk.msra.mxu0 %vm168_vm0, %v15_v1  ;;  %894 = vmatpush1.msk.msra.mxu1 %vm168_vm0, %v15_v1  ;;  %v33_v6 = vld [vmem:[%s1372_s1 + $0x80] sm:$0xff]  ;;  %v34_v9 = vld [vmem:[%s1372_s1 + $0x88] sm:$0xff]  ;;  %v49_v11 = vld [vmem:[%s1373_s2 + $0x10] sm:$0xff] }
   0x4   :  { %863 = vmatmul.mubr.msk.f32.vlgmr.msra.gmra.mrb[0].mxu0 %vm77_vm1, %v17_v2  ;;  %878 = vmatmul.mubr.msk.f32.vlgmr.msra.gmra.mrb[0].mxu1 %vm77_vm1, %v32_v3  ;;  %v47_v10 = vld [vmem:[%s1373_s2] sm:$0xff]  ;;  %v20_v12 = vld [vmem:[%s1372_s1 + $0x18] sm:$0xff]  ;;  %v35_v13 = vld [vmem:[%s1372_s1 + $0x90] sm:$0xff] }
   0x5   :  { %245 = vmatprep.mubr.f32.mxu0 %v925_v4  ;;  %335 = vmatprep.mubr.f32.mxu1 %v925_v4  ;;  %v48_v14 = vld [vmem:[%s1373_s2 + $0x8] sm:$0xff]  ;;  %v50_v15 = vld [vmem:[%s1373_s2 + $0x18] sm:$0xff]  ;;  %v21_v16 = vld [vmem:[%s1372_s1 + $0x20] sm:$0xff] }
   0x6   :  { %899 = vset.pattern.permute.xlu0 %v926_v7  ;;  %900 = vset.pattern.permute.xlu1 %v926_v7  ;;  %v36_v17 = vld [vmem:[%s1372_s1 + $0x98] sm:$0xff]  ;;  %v51_v18 = vld [vmem:[%s1373_s2 + $0x20] sm:$0xff]  ;;  %v52_v19 = vld [vmem:[%s1373_s2 + $0x28] sm:$0xff] }
   0x7   :  { %542 = vperm.xlu0 %899, %v47_v10   ;;  %552 = vperm.xlu1 %900, %v49_v11   ;;  %v22_v20 = vld [vmem:[%s1372_s1 + $0x28] sm:$0xff]  ;;  %v37_v21 = vld [vmem:[%s1372_s1 + $0xa0] sm:$0xff] }
   0x8   :  { %864 = vmatmul.mubr.msk.f32.gmra.mrb[2].mxu0 %vm77_vm1, %v18_v5  ;;  %879 = vmatmul.mubr.msk.f32.gmra.mrb[2].mxu1 %vm77_vm1, %v33_v6 }
   0x9   :  { %251 = vmatprep.mubr.f32.mxu0 %v925_v4  ;;  %341 = vmatprep.mubr.f32.mxu1 %v925_v4 }
   0xb   :  { %547 = vperm.xlu0 %899, %v48_v14   ;;  %557 = vperm.xlu1 %900, %v50_v15  }
   0xc   :  { %865 = vmatmul.mubr.msk.f32.gmra.mrb[4].mxu0 %vm77_vm1, %v19_v8  ;;  %880 = vmatmul.mubr.msk.f32.gmra.mrb[4].mxu1 %vm77_vm1, %v34_v9 }
   0xd   :  { %257 = vmatprep.mubr.f32.mxu0 %v925_v4  ;;  %347 = vmatprep.mubr.f32.mxu1 %v925_v4 }
  0x10   :  { %866 = vmatmul.mubr.msk.f32.gmra.mrb[6].mxu0 %vm77_vm1, %v20_v12  ;;  %881 = vmatmul.mubr.msk.f32.gmra.mrb[6].mxu1 %vm77_vm1, %v35_v13 }
  0x11   :  { %263 = vmatprep.mubr.f32.mxu0 %v925_v4  ;;  %353 = vmatprep.mubr.f32.mxu1 %v925_v4 }
  0x14   :  { %867 = vmatmul.mubr.msk.f32.gmra.mrb[8].mxu0 %vm77_vm1, %v21_v16  ;;  %882 = vmatmul.mubr.msk.f32.gmra.mrb[8].mxu1 %vm77_vm1, %v36_v17 }
  0x15   :  { %269 = vmatprep.mubr.f32.mxu0 %v925_v4  ;;  %359 = vmatprep.mubr.f32.mxu1 %v925_v4 }
  0x16   :  { %8 = vsyncpa [#allocation3], 0  ;;  %562 = vperm.xlu0 %899, %v51_v18   ;;  %567 = vperm.xlu1 %900, %v52_v19   ;;  %v53_v22 = vld [vmem:[%s1373_s2 + $0x30] sm:$0xff]  ;;  %v54_v23 = vld [vmem:[%s1373_s2 + $0x38] sm:$0xff] }
  0x17   :  { %v23_v24 = vld [vmem:[%s1372_s1 + $0x30] sm:$0xff]  ;;  %v38_v25 = vld [vmem:[%s1372_s1 + $0xa8] sm:$0xff]  ;;  %v55_v26 = vld [vmem:[%s1373_s2 + $0x40] sm:$0xff] }
  0x18   :  { %868 = vmatmul.mubr.msk.f32.gmra.mrb[10].mxu0 %vm77_vm1, %v22_v20  ;;  %883 = vmatmul.mubr.msk.f32.gmra.mrb[10].mxu1 %vm77_vm1, %v37_v21  ;;  %v56_v27 = vld [vmem:[%s1373_s2 + $0x48] sm:$0xff]  ;;  %v24_v28 = vld [vmem:[%s1372_s1 + $0x38] sm:$0xff]  ;;  %v39_v29 = vld [vmem:[%s1372_s1 + $0xb0] sm:$0xff] }
  0x19   :  { %275 = vmatprep.mubr.f32.mxu0 %v925_v4  ;;  %365 = vmatprep.mubr.f32.mxu1 %v925_v4  ;;  %v57_v30 = vld [vmem:[%s1373_s2 + $0x50] sm:$0xff]  ;;  %v58_v31 = vld [vmem:[%s1373_s2 + $0x58] sm:$0xff]  ;;  %v25_v32 = vld [vmem:[%s1372_s1 + $0x40] sm:$0xff] }
  0x1a   :  { %572 = vperm.xlu0 %899, %v53_v22   ;;  %577 = vperm.xlu1 %900, %v54_v23   ;;  %v40_v33 = vld [vmem:[%s1372_s1 + $0xb8] sm:$0xff]  ;;  %v59_v34 = vld [vmem:[%s1373_s2 + $0x60] sm:$0xff]  ;;  %v60_v35 = vld [vmem:[%s1373_s2 + $0x68] sm:$0xff] }
  0x1b   :  { %v26_v36 = vld [vmem:[%s1372_s1 + $0x48] sm:$0xff]  ;;  %v41_v37 = vld [vmem:[%s1372_s1 + $0xc0] sm:$0xff]  ;;  %v61_v38 = vld [vmem:[%s1373_s2 + $0x70] sm:$0xff] }
  0x1c   :  { %869 = vmatmul.mubr.msk.f32.gmra.mrb[12].mxu0 %vm77_vm1, %v23_v24  ;;  %884 = vmatmul.mubr.msk.f32.gmra.mrb[12].mxu1 %vm77_vm1, %v38_v25  ;;  %v62_v39 = vld [vmem:[%s1373_s2 + $0x78] sm:$0xff]  ;;  %v27_v40 = vld [vmem:[%s1372_s1 + $0x50] sm:$0xff]  ;;  %v42_v41 = vld [vmem:[%s1372_s1 + $0xc8] sm:$0xff] }
  0x1d   :  { %281 = vmatprep.mubr.f32.mxu0 %v925_v4  ;;  %371 = vmatprep.mubr.f32.mxu1 %v925_v4  ;;  %v63_v42 = vld [vmem:[%s1373_s2 + $0x80] sm:$0xff]  ;;  %v64_v43 = vld [vmem:[%s1373_s2 + $0x88] sm:$0xff]  ;;  %v28_v44 = vld [vmem:[%s1372_s1 + $0x58] sm:$0xff] }
  0x1e   :  { %582 = vperm.xlu0 %899, %v55_v26   ;;  %587 = vperm.xlu1 %900, %v56_v27   ;;  %v43_v45 = vld [vmem:[%s1372_s1 + $0xd0] sm:$0xff]  ;;  %v66_v47 = vld [vmem:[%s1373_s2 + $0x98] sm:$0xff]  ;;  %v29_v48 = vld [vmem:[%s1372_s1 + $0x60] sm:$0xff] }
  0x1f   :  { %v65_v46 = vld [vmem:[%s1373_s2 + $0x90] sm:$0xff]  ;;  %v44_v49 = vld [vmem:[%s1372_s1 + $0xd8] sm:$0xff]  ;;  %v67_v50 = vld [vmem:[%s1373_s2 + $0xa0] sm:$0xff] }
  0x20   :  { %870 = vmatmul.mubr.msk.f32.gmra.mrb[14].mxu0 %vm77_vm1, %v24_v28  ;;  %885 = vmatmul.mubr.msk.f32.gmra.mrb[14].mxu1 %vm77_vm1, %v39_v29  ;;  %v68_v51 = vld [vmem:[%s1373_s2 + $0xa8] sm:$0xff]  ;;  %v45_v53 = vld [vmem:[%s1372_s1 + $0xe0] sm:$0xff]  ;;  %v69_v54 = vld [vmem:[%s1373_s2 + $0xb0] sm:$0xff] }
  0x21   :  { %287 = vmatprep.mubr.f32.mxu0 %v925_v4  ;;  %377 = vmatprep.mubr.f32.mxu1 %v925_v4  ;;  %v30_v52 = vld [vmem:[%s1372_s1 + $0x68] sm:$0xff]  ;;  %v70_v55 = vld [vmem:[%s1373_s2 + $0xb8] sm:$0xff]  ;;  %v31_v56 = vld [vmem:[%s1372_s1 + $0x70] sm:$0xff] }
  0x22   :  { %592 = vperm.xlu0 %899, %v57_v30   ;;  %597 = vperm.xlu1 %900, %v58_v31   ;;  %v46_v57 = vld [vmem:[%s1372_s1 + $0xe8] sm:$0xff]  ;;  %v71_v58 = vld [vmem:[%s1373_s2 + $0xc0] sm:$0xff]  ;;  %v73_v60 = vld [vmem:[%s1373_s2 + $0xd0] sm:$0xff] }
  0x23   :  { %v72_v59 = vld [vmem:[%s1373_s2 + $0xc8] sm:$0xff]  ;;  %v74_v61 = vld [vmem:[%s1373_s2 + $0xd8] sm:$0xff]  ;;  %v75_v62 = vld [vmem:[%s1373_s2 + $0xe0] sm:$0xff] }
  0x24   :  { %871 = vmatmul.mubr.msk.f32.gmra.mrb[16].mxu0 %vm77_vm1, %v25_v32  ;;  %886 = vmatmul.mubr.msk.f32.gmra.mrb[16].mxu1 %vm77_vm1, %v40_v33  ;;  %v76_v63 = vld [vmem:[%s1373_s2 + $0xe8] sm:$0xff]  ;;  %s928_s2 = smov [#allocation2]  }
  0x25   :  { %293 = vmatprep.mubr.f32.mxu0 %v925_v4  ;;  %383 = vmatprep.mubr.f32.mxu1 %v925_v4  ;;  %s853_s22 = sshll.u32 %s928_s2, 4  ;;  %s854_s22 = int_to_ptr.vmem [resolvable:$true] %s853_s22 }
  0x26   :  { %602 = vperm.xlu0 %899, %v59_v34   ;;  %607 = vperm.xlu1 %900, %v60_v35   ;;  %s901_s23 = scalar_lea.vmem %s854_s22, 32  ;;  %p906_p1 = scmp.lt.s32.totalorder %s854_s22, %s854_s22 }
  0x27   :  { %p902_p0 = scmp.ne.s32.totalorder %s854_s22, %s901_s23  ;;  %p907_p2 = scmp.lt.s32.totalorder %s901_s23, %s901_s23 }
  0x28   :  { %872 = vmatmul.mubr.msk.f32.gmra.mrb[18].mxu0 %vm77_vm1, %v26_v36  ;;  %887 = vmatmul.mubr.msk.f32.gmra.mrb[18].mxu1 %vm77_vm1, %v41_v37 }
  0x29   :  { %299 = vmatprep.mubr.f32.mxu0 %v925_v4  ;;  %389 = vmatprep.mubr.f32.mxu1 %v925_v4  ;;  %p908_p3 = por %p907_p2, %p906_p1 }
  0x2a   :  { %612 = vperm.xlu0 %899, %v61_v38   ;;  %617 = vperm.xlu1 %900, %v62_v39  }
  0x2b   :  { %p909_p4 = pnand %p908_p3, %p902_p0 }
  0x2c   :  { %873 = vmatmul.mubr.msk.f32.gmra.mrb[20].mxu0 %vm77_vm1, %v27_v40  ;;  %888 = vmatmul.mubr.msk.f32.gmra.mrb[20].mxu1 %vm77_vm1, %v42_v41 }
  0x2d   :  { %305 = vmatprep.mubr.f32.mxu0 %v925_v4  ;;  %395 = vmatprep.mubr.f32.mxu1 %v925_v4 }
  0x2e   :  { %622 = vperm.xlu0 %899, %v63_v42   ;;  %627 = vperm.xlu1 %900, %v64_v43  }
  0x30   :  { %874 = vmatmul.mubr.msk.f32.gmra.mrb[22].mxu0 %vm77_vm1, %v28_v44  ;;  %889 = vmatmul.mubr.msk.f32.gmra.mrb[22].mxu1 %vm77_vm1, %v43_v45 }
  0x31   :  { %311 = vmatprep.mubr.f32.mxu0 %v925_v4  ;;  %401 = vmatprep.mubr.f32.mxu1 %v925_v4 }
  0x32   :  { %632 = vperm.xlu0 %899, %v65_v46   ;;  %637 = vperm.xlu1 %900, %v66_v47  }
  0x34   :  { %875 = vmatmul.mubr.msk.f32.gmra.mrb[24].mxu0 %vm77_vm1, %v29_v48  ;;  %890 = vmatmul.mubr.msk.f32.gmra.mrb[24].mxu1 %vm77_vm1, %v44_v49 }
  0x35   :  { %317 = vmatprep.mubr.f32.mxu0 %v925_v4  ;;  %407 = vmatprep.mubr.f32.mxu1 %v925_v4 }
  0x36   :  { %642 = vperm.xlu0 %899, %v67_v50   ;;  %647 = vperm.xlu1 %900, %v68_v51  }
  0x38   :  { %876 = vmatmul.mubr.msk.f32.gmra.mrb[26].mxu0 %vm77_vm1, %v30_v52  ;;  %891 = vmatmul.mubr.msk.f32.gmra.mrb[26].mxu1 %vm77_vm1, %v45_v53 }
  0x39   :  { %323 = vmatprep.mubr.f32.mxu0 %v925_v4  ;;  %413 = vmatprep.mubr.f32.mxu1 %v925_v4 }
  0x3a   :  { %652 = vperm.xlu0 %899, %v69_v54   ;;  %657 = vperm.xlu1 %900, %v70_v55  }
  0x3c   :  { %877 = vmatmul.mubr.msk.f32.gmra.mrb[28].mxu0 %vm77_vm1, %v31_v56  ;;  %892 = vmatmul.mubr.msk.f32.gmra.mrb[28].mxu1 %vm77_vm1, %v46_v57 }
  0x3e   :  { %662 = vperm.xlu0 %899, %v71_v58   ;;  %667 = vperm.xlu1 %900, %v72_v59  }
  0x42   :  { %672 = vperm.xlu0 %899, %v73_v60   ;;  %677 = vperm.xlu1 %900, %v74_v61  }
  0x46   :  { %682 = vperm.xlu0 %899, %v75_v62   ;;  %687 = vperm.xlu1 %900, %v76_v63  }
  0x86   :  { %v543_v0 = vpop.permute.xlu0 %542  ;;  %v553_v1 = vpop.permute.xlu1 %552 }
  0x8a   :  { %v548_v2 = vpop.permute.xlu0 %547  ;;  %v558_v3 = vpop.permute.xlu1 %557 }
  0x95   :  { %v563_v10 = vpop.permute.xlu0 %562  ;;  %v1203_v19 = vpop.permute.xlu1 %567 }
  0x99   :  { %v1209_v32 = vpop.permute.xlu0 %572  ;;  %v1215_v45 = vpop.permute.xlu1 %577 }
  0x9d   :  { %v1221_v58 = vpop.permute.xlu0 %582 }
  0xd7   :  { %v241_v4 = vpop.f32.mrb[0].mxu0  ;;  %v1195_v5 = vpop.f32.mrb[0].mxu1 }
  0xd8   :  { %v420_v6 = vmul.f32 0.01, %v241_v4  ;;  %v243_v7 = vpop.f32.mrb[1].mxu0  ;;  %v1197_v8 = vpop.f32.mrb[1].mxu1 }
  0xd9   :  { %v421_v9 = vmul.f32 0.01, %v243_v7 }
  0xda   :  { %v480_v13 = vmax.f32 %v420_v6, %v241_v4 }
  0xdb   :  { %v247_v11 = vpop.f32.mrb[2].mxu0  ;;  %v1199_v12 = vpop.f32.mrb[2].mxu1  ;;  %v481_v17 = vmax.f32 %v421_v9, %v243_v7 }
  0xdc   :  { %v422_v14 = vmul.f32 0.01, %v247_v11  ;;  %v249_v15 = vpop.f32.mrb[3].mxu0  ;;  %v1201_v16 = vpop.f32.mrb[3].mxu1  ;;  %v690_v24 = vmul.f32 %v543_v0, %v480_v13 }
  0xdd   :  { %v423_v18 = vmul.f32 0.01, %v249_v15  ;;  %v691_v29 = vmul.f32 %v543_v0, %v481_v17 }
  0xde   :  { %v482_v20 = vmax.f32 %v422_v14, %v247_v11  ;;  %v1227_v11 = vpop.permute.xlu1 %587 }
  0xdf   :  { %v483_v21 = vmax.f32 %v423_v18, %v249_v15  ;;  %v253_v22 = vpop.f32.mrb[4].mxu0  ;;  %v1205_v23 = vpop.f32.mrb[4].mxu1 }
  0xe0   :  { %v692_v25 = vmul.f32 %v548_v2, %v482_v20  ;;  %v424_v26 = vmul.f32 0.01, %v253_v22  ;;  %v255_v27 = vpop.f32.mrb[5].mxu0  ;;  %v1207_v28 = vpop.f32.mrb[5].mxu1 }
  0xe1   :  { %v693_v30 = vmul.f32 %v548_v2, %v483_v21  ;;  %v425_v31 = vmul.f32 0.01, %v255_v27 }
  0xe2   :  { %v750_v33 = vadd.f32 %v692_v25, %v690_v24  ;;  %v484_v34 = vmax.f32 %v424_v26, %v253_v22 }
  0xe3   :  { %v785_v35 = vadd.f32 %v693_v30, %v691_v29  ;;  %v485_v36 = vmax.f32 %v425_v31, %v255_v27  ;;  %v259_v37 = vpop.f32.mrb[6].mxu0  ;;  %v1211_v38 = vpop.f32.mrb[6].mxu1 }
  0xe4   :  { %v694_v39 = vmul.f32 %v553_v1, %v484_v34  ;;  %v426_v40 = vmul.f32 0.01, %v259_v37  ;;  %v261_v41 = vpop.f32.mrb[7].mxu0  ;;  %v1213_v42 = vpop.f32.mrb[7].mxu1 }
  0xe5   :  { %v695_v43 = vmul.f32 %v553_v1, %v485_v36  ;;  %v427_v44 = vmul.f32 0.01, %v261_v41 }
  0xe6   :  { %v751_v46 = vadd.f32 %v750_v33, %v694_v39  ;;  %v486_v47 = vmax.f32 %v426_v40, %v259_v37 }
  0xe7   :  { %v786_v48 = vadd.f32 %v785_v35, %v695_v43  ;;  %v487_v49 = vmax.f32 %v427_v44, %v261_v41  ;;  %v265_v50 = vpop.f32.mrb[8].mxu0  ;;  %v1217_v51 = vpop.f32.mrb[8].mxu1 }
  0xe8   :  { %v696_v52 = vmul.f32 %v558_v3, %v486_v47  ;;  %v428_v53 = vmul.f32 0.01, %v265_v50  ;;  %v267_v54 = vpop.f32.mrb[9].mxu0  ;;  %v1219_v55 = vpop.f32.mrb[9].mxu1 }
  0xe9   :  { %v697_v56 = vmul.f32 %v558_v3, %v487_v49  ;;  %v429_v57 = vmul.f32 0.01, %v267_v54 }
  0xea   :  { %v752_v59 = vadd.f32 %v751_v46, %v696_v52  ;;  %v488_v60 = vmax.f32 %v428_v53, %v265_v50 }
  0xeb   :  { %v787_v61 = vadd.f32 %v786_v48, %v697_v56  ;;  %v489_v62 = vmax.f32 %v429_v57, %v267_v54  ;;  %v271_v63 = vpop.f32.mrb[10].mxu0  ;;  %v1223_v0 = vpop.f32.mrb[10].mxu1 }
  0xec   :  { %v698_v1 = vmul.f32 %v563_v10, %v488_v60  ;;  %v430_v2 = vmul.f32 0.01, %v271_v63  ;;  %v273_v4 = vpop.f32.mrb[11].mxu0  ;;  %v1225_v6 = vpop.f32.mrb[11].mxu1 }
  0xed   :  { %v699_v7 = vmul.f32 %v563_v10, %v489_v62  ;;  %v431_v9 = vmul.f32 0.01, %v273_v4  ;;  %v1235_v10 = vpop.permute.xlu0 %592 }
  0xee   :  { %v753_v3 = vadd.f32 %v752_v59, %v698_v1  ;;  %v490_v13 = vmax.f32 %v430_v2, %v271_v63 }
  0xef   :  { %v788_v14 = vadd.f32 %v787_v61, %v699_v7  ;;  %v491_v15 = vmax.f32 %v431_v9, %v273_v4  ;;  %v277_v17 = vpop.f32.mrb[12].mxu0  ;;  %v1229_v18 = vpop.f32.mrb[12].mxu1 }
  0xf0   :  { %v700_v20 = vmul.f32 %v1203_v19, %v490_v13  ;;  %v432_v21 = vmul.f32 0.01, %v277_v17  ;;  %v279_v22 = vpop.f32.mrb[13].mxu0  ;;  %v1232_v24 = vpop.f32.mrb[13].mxu1 }
  0xf1   :  { %v701_v25 = vmul.f32 %v1203_v19, %v491_v15  ;;  %v433_v26 = vmul.f32 0.01, %v279_v22  ;;  %v1243_v19 = vpop.permute.xlu1 %597 }
  0xf2   :  { %v754_v27 = vadd.f32 %v753_v3, %v700_v20  ;;  %v492_v29 = vmax.f32 %v432_v21, %v277_v17 }
  0xf3   :  { %v789_v30 = vadd.f32 %v788_v14, %v701_v25  ;;  %v493_v31 = vmax.f32 %v433_v26, %v279_v22  ;;  %v283_v33 = vpop.f32.mrb[14].mxu0  ;;  %v1237_v34 = vpop.f32.mrb[14].mxu1 }
  0xf4   :  { %v702_v35 = vmul.f32 %v1209_v32, %v492_v29  ;;  %v434_v36 = vmul.f32 0.01, %v283_v33  ;;  %v285_v37 = vpop.f32.mrb[15].mxu0  ;;  %v1240_v39 = vpop.f32.mrb[15].mxu1 }
  0xf5   :  { %v703_v40 = vmul.f32 %v1209_v32, %v493_v31  ;;  %v435_v41 = vmul.f32 0.01, %v285_v37  ;;  %v1251_v32 = vpop.permute.xlu0 %602 }
  0xf6   :  { %v755_v43 = vadd.f32 %v754_v27, %v702_v35  ;;  %v494_v44 = vmax.f32 %v434_v36, %v283_v33 }
  0xf7   :  { %v790_v46 = vadd.f32 %v789_v30, %v703_v40  ;;  %v495_v47 = vmax.f32 %v435_v41, %v285_v37  ;;  %v289_v48 = vpop.f32.mrb[16].mxu0  ;;  %v1245_v49 = vpop.f32.mrb[16].mxu1 }
  0xf8   :  { %v704_v50 = vmul.f32 %v1215_v45, %v494_v44  ;;  %v436_v52 = vmul.f32 0.01, %v289_v48  ;;  %v291_v53 = vpop.f32.mrb[17].mxu0  ;;  %v1248_v54 = vpop.f32.mrb[17].mxu1 }
  0xf9   :  { %v705_v56 = vmul.f32 %v1215_v45, %v495_v47  ;;  %v437_v57 = vmul.f32 0.01, %v291_v53  ;;  %v1259_v45 = vpop.permute.xlu1 %607 }
  0xfa   :  { %v756_v59 = vadd.f32 %v755_v43, %v704_v50  ;;  %v496_v60 = vmax.f32 %v436_v52, %v289_v48 }
  0xfb   :  { %v791_v61 = vadd.f32 %v790_v46, %v705_v56  ;;  %v497_v62 = vmax.f32 %v437_v57, %v291_v53  ;;  %v295_v63 = vpop.f32.mrb[18].mxu0  ;;  %v1253_v1 = vpop.f32.mrb[18].mxu1 }
  0xfc   :  { %v706_v2 = vmul.f32 %v1221_v58, %v496_v60  ;;  %v438_v4 = vmul.f32 0.01, %v295_v63  ;;  %v297_v7 = vpop.f32.mrb[19].mxu0  ;;  %v1256_v9 = vpop.f32.mrb[19].mxu1 }
  0xfd   :  { %v707_v3 = vmul.f32 %v1221_v58, %v497_v62  ;;  %v439_v13 = vmul.f32 0.01, %v297_v7  ;;  %v1267_v58 = vpop.permute.xlu0 %612 }
  0xfe   :  { %v757_v14 = vadd.f32 %v756_v59, %v706_v2  ;;  %v498_v15 = vmax.f32 %v438_v4, %v295_v63 }
  0xff   :  { %v792_v17 = vadd.f32 %v791_v61, %v707_v3  ;;  %v499_v20 = vmax.f32 %v439_v13, %v297_v7  ;;  %v301_v21 = vpop.f32.mrb[20].mxu0  ;;  %v1261_v22 = vpop.f32.mrb[20].mxu1 }
 0x100   :  { %v708_v25 = vmul.f32 %v1227_v11, %v498_v15  ;;  %v440_v26 = vmul.f32 0.01, %v301_v21  ;;  %v303_v27 = vpop.f32.mrb[21].mxu0  ;;  %v1264_v29 = vpop.f32.mrb[21].mxu1 }
 0x101   :  { %v709_v30 = vmul.f32 %v1227_v11, %v499_v20  ;;  %v441_v31 = vmul.f32 0.01, %v303_v27  ;;  %v1275_v11 = vpop.permute.xlu1 %617 }
 0x102   :  { %v758_v33 = vadd.f32 %v757_v14, %v708_v25  ;;  %v500_v35 = vmax.f32 %v440_v26, %v301_v21 }
 0x103   :  { %v793_v36 = vadd.f32 %v792_v17, %v709_v30  ;;  %v501_v37 = vmax.f32 %v441_v31, %v303_v27  ;;  %v307_v40 = vpop.f32.mrb[22].mxu0  ;;  %v1269_v41 = vpop.f32.mrb[22].mxu1 }
 0x104   :  { %v710_v43 = vmul.f32 %v1235_v10, %v500_v35  ;;  %v442_v44 = vmul.f32 0.01, %v307_v40  ;;  %v309_v46 = vpop.f32.mrb[23].mxu0  ;;  %v1272_v47 = vpop.f32.mrb[23].mxu1 }
 0x105   :  { %v711_v48 = vmul.f32 %v1235_v10, %v501_v37  ;;  %v443_v50 = vmul.f32 0.01, %v309_v46  ;;  %v623_v10 = vpop.permute.xlu0 %622  ;;  %v628_v30 = vpop.permute.xlu1 %627  ;;  %v451_v37 = vmul.f32 0.01, %v1197_v8 }
 0x106   :  { %v759_v52 = vadd.f32 %v758_v33, %v710_v43  ;;  %v502_v53 = vmax.f32 %v442_v44, %v307_v40 }
 0x107   :  { %v794_v56 = vadd.f32 %v793_v36, %v711_v48  ;;  %v503_v57 = vmax.f32 %v443_v50, %v309_v46  ;;  %v313_v59 = vpop.f32.mrb[24].mxu0  ;;  %v1277_v60 = vpop.f32.mrb[24].mxu1  ;;  %v452_v48 = vmul.f32 0.01, %v1199_v12 }
 0x108   :  { %v712_v61 = vmul.f32 %v1243_v19, %v502_v53  ;;  %v444_v62 = vmul.f32 0.01, %v313_v59  ;;  %v315_v63 = vpop.f32.mrb[25].mxu0  ;;  %v1280_v2 = vpop.f32.mrb[25].mxu1 }
 0x109   :  { %v713_v4 = vmul.f32 %v1243_v19, %v503_v57  ;;  %v445_v7 = vmul.f32 0.01, %v315_v63  ;;  %v450_v19 = vmul.f32 0.01, %v1195_v5  ;;  %v453_v57 = vmul.f32 0.01, %v1201_v16 }
 0x10a   :  { %v760_v3 = vadd.f32 %v759_v52, %v712_v61  ;;  %v504_v13 = vmax.f32 %v444_v62, %v313_v59 }
 0x10b   :  { %v795_v14 = vadd.f32 %v794_v56, %v713_v4  ;;  %v505_v15 = vmax.f32 %v445_v7, %v315_v63  ;;  %v319_v17 = vpop.f32.mrb[26].mxu0  ;;  %v1283_v20 = vpop.f32.mrb[26].mxu1  ;;  %v510_v62 = vmax.f32 %v450_v19, %v1195_v5  ;;  %v454_v63 = vmul.f32 0.01, %v1205_v23 }
 0x10c   :  { %v714_v21 = vmul.f32 %v1251_v32, %v504_v13  ;;  %v446_v25 = vmul.f32 0.01, %v319_v17  ;;  %v321_v26 = vpop.f32.mrb[27].mxu0  ;;  %v1286_v27 = vpop.f32.mrb[27].mxu1  ;;  %v511_v13 = vmax.f32 %v451_v37, %v1197_v8  ;;  %v457_v5 = vmul.f32 0.01, %v1213_v42 }
 0x10d   :  { %v715_v31 = vmul.f32 %v1251_v32, %v505_v15  ;;  %v447_v33 = vmul.f32 0.01, %v321_v26  ;;  %v633_v32 = vpop.permute.xlu0 %632  ;;  %v514_v8 = vmax.f32 %v454_v63, %v1205_v23  ;;  %v458_v19 = vmul.f32 0.01, %v1217_v51 }
 0x10e   :  { %v761_v35 = vadd.f32 %v760_v3, %v714_v21  ;;  %v506_v36 = vmax.f32 %v446_v25, %v319_v17  ;;  %v638_v3 = vpop.permute.xlu1 %637  ;;  %v512_v21 = vmax.f32 %v452_v48, %v1199_v12  ;;  %v456_v25 = vmul.f32 0.01, %v1211_v38 }
 0x10f   :  { %v796_v40 = vadd.f32 %v795_v14, %v715_v31  ;;  %v507_v43 = vmax.f32 %v447_v33, %v321_v26  ;;  %v325_v44 = vpop.f32.mrb[28].mxu0  ;;  %v1291_v46 = vpop.f32.mrb[28].mxu1  ;;  %v455_v14 = vmul.f32 0.01, %v1207_v28  ;;  %v513_v26 = vmax.f32 %v453_v57, %v1201_v16 }
 0x110   :  { %v716_v50 = vmul.f32 %v1259_v45, %v506_v36  ;;  %v448_v52 = vmul.f32 0.01, %v325_v44  ;;  %v327_v53 = vpop.f32.mrb[29].mxu0  ;;  %v1295_v56 = vpop.f32.mrb[29].mxu1  ;;  %v720_v33 = vmul.f32 %v1275_v11, %v510_v62  ;;  %v721_v12 = vmul.f32 %v1275_v11, %v511_v13 }
 0x111   :  { %v717_v59 = vmul.f32 %v1259_v45, %v507_v43  ;;  %v449_v61 = vmul.f32 0.01, %v327_v53  ;;  %v643_v36 = vpop.permute.xlu0 %642  ;;  %v515_v37 = vmax.f32 %v455_v14, %v1207_v28  ;;  %v722_v16 = vmul.f32 %v623_v10, %v512_v21 }
 0x112   :  { %v762_v4 = vadd.f32 %v761_v35, %v716_v50  ;;  %v508_v7 = vmax.f32 %v448_v52, %v325_v44  ;;  %v516_v44 = vmax.f32 %v456_v25, %v1211_v38  ;;  %v723_v50 = vmul.f32 %v623_v10, %v513_v26  ;;  %v648_v52 = vpop.permute.xlu1 %647 }
 0x113   :  { %v797_v15 = vadd.f32 %v796_v40, %v717_v59  ;;  %v509_v17 = vmax.f32 %v449_v61, %v327_v53  ;;  %v459_v40 = vmul.f32 0.01, %v1219_v55  ;;  %v517_v23 = vmax.f32 %v457_v5, %v1213_v42 }
 0x114   :  { %v718_v45 = vmul.f32 %v1267_v58, %v508_v7  ;;  %v461_v53 = vmul.f32 0.01, %v1225_v6  ;;  %v724_v59 = vmul.f32 %v628_v30, %v514_v8  ;;  %v518_v11 = vmax.f32 %v458_v19, %v1217_v51 }
 0x115   :  { %v719_v31 = vmul.f32 %v1267_v58, %v509_v17  ;;  %v460_v58 = vmul.f32 0.01, %v1223_v0  ;;  %v462_v28 = vmul.f32 0.01, %v1229_v18  ;;  %v725_v62 = vmul.f32 %v628_v30, %v515_v37  ;;  %v653_v14 = vpop.permute.xlu0 %652 }
 0x116   :  { %v763_v35 = vadd.f32 %v762_v4, %v718_v45  ;;  %v519_v63 = vmax.f32 %v459_v40, %v1219_v55  ;;  %v463_v38 = vmul.f32 0.01, %v1232_v24  ;;  %v726_v7 = vmul.f32 %v633_v32, %v516_v44  ;;  %v658_v26 = vpop.permute.xlu1 %657 }
 0x117   :  { %v798_v43 = vadd.f32 %v797_v15, %v719_v31  ;;  %v520_v10 = vmax.f32 %v460_v58, %v1223_v0  ;;  %v464_v42 = vmul.f32 0.01, %v1237_v34  ;;  %v727_v15 = vmul.f32 %v633_v32, %v517_v23 }
 0x118   :  { %v764_v48 = vadd.f32 %v763_v35, %v720_v33  ;;  %v521_v17 = vmax.f32 %v461_v53, %v1225_v6  ;;  %v465_v51 = vmul.f32 0.01, %v1240_v39  ;;  %v728_v25 = vmul.f32 %v638_v3, %v518_v11 }
 0x119   :  { %v799_v57 = vadd.f32 %v798_v43, %v721_v12  ;;  %v522_v30 = vmax.f32 %v462_v28, %v1229_v18  ;;  %v466_v55 = vmul.f32 0.01, %v1245_v49  ;;  %v729_v5 = vmul.f32 %v638_v3, %v519_v63 }
 0x11a   :  { %v765_v61 = vadd.f32 %v764_v48, %v722_v16  ;;  %v523_v0 = vmax.f32 %v463_v38, %v1232_v24  ;;  %v467_v31 = vmul.f32 0.01, %v1248_v54  ;;  %v730_v8 = vmul.f32 %v643_v36, %v520_v10  ;;  %v663_v16 = vpop.permute.xlu0 %662  ;;  %v668_v53 = vpop.permute.xlu1 %667 }
 0x11b   :  { %v800_v4 = vadd.f32 %v799_v57, %v723_v50  ;;  %v524_v32 = vmax.f32 %v464_v42, %v1237_v34  ;;  %v468_v6 = vmul.f32 0.01, %v1253_v1  ;;  %v731_v35 = vmul.f32 %v643_v36, %v521_v17 }
 0x11c   :  { %v766_v13 = vadd.f32 %v765_v61, %v724_v59  ;;  %v525_v12 = vmax.f32 %v465_v51, %v1240_v39  ;;  %v469_v18 = vmul.f32 0.01, %v1256_v9  ;;  %v732_v40 = vmul.f32 %v648_v52, %v522_v30 }
 0x11d   :  { %v801_v21 = vadd.f32 %v800_v4, %v725_v62  ;;  %v526_v3 = vmax.f32 %v466_v55, %v1245_v49  ;;  %v470_v24 = vmul.f32 0.01, %v1261_v22  ;;  %v733_v44 = vmul.f32 %v648_v52, %v523_v0 }
 0x11e   :  { %v767_v45 = vadd.f32 %v766_v13, %v726_v7  ;;  %v527_v58 = vmax.f32 %v467_v31, %v1248_v54  ;;  %v471_v34 = vmul.f32 0.01, %v1264_v29  ;;  %v734_v50 = vmul.f32 %v653_v14, %v524_v32  ;;  %v673_v42 = vpop.permute.xlu0 %672 }
 0x11f   :  { %v802_v33 = vadd.f32 %v801_v21, %v727_v15  ;;  %v528_v36 = vmax.f32 %v468_v6, %v1253_v1  ;;  %v472_v39 = vmul.f32 0.01, %v1269_v41  ;;  %v735_v57 = vmul.f32 %v653_v14, %v525_v12 }
 0x120   :  { %v768_v19 = vadd.f32 %v767_v45, %v728_v25  ;;  %v529_v49 = vmax.f32 %v469_v18, %v1256_v9  ;;  %v473_v59 = vmul.f32 0.01, %v1272_v47  ;;  %v736_v28 = vmul.f32 %v658_v26, %v526_v3  ;;  %v678_v25 = vpop.permute.xlu1 %677 }
 0x121   :  { %v803_v37 = vadd.f32 %v802_v33, %v729_v5  ;;  %v530_v52 = vmax.f32 %v470_v24, %v1261_v22  ;;  %v474_v54 = vmul.f32 0.01, %v1277_v60  ;;  %v737_v62 = vmul.f32 %v658_v26, %v527_v58 }
 0x122   :  { %v769_v43 = vadd.f32 %v768_v19, %v730_v8  ;;  %v531_v63 = vmax.f32 %v471_v34, %v1264_v29  ;;  %v475_v1 = vmul.f32 0.01, %v1280_v2  ;;  %v738_v4 = vmul.f32 %v663_v16, %v528_v36  ;;  %v683_v6 = vpop.permute.xlu0 %682 }
 0x123   :  { %v804_v48 = vadd.f32 %v803_v37, %v731_v35  ;;  %v532_v7 = vmax.f32 %v472_v39, %v1269_v41  ;;  %v476_v9 = vmul.f32 0.01, %v1283_v20  ;;  %v739_v13 = vmul.f32 %v663_v16, %v529_v49 }
 0x124   :  { %v770_v23 = vadd.f32 %v769_v43, %v732_v40  ;;  %v533_v14 = vmax.f32 %v473_v59, %v1272_v47  ;;  %v477_v22 = vmul.f32 0.01, %v1286_v27  ;;  %v740_v17 = vmul.f32 %v668_v53, %v530_v52  ;;  %v688_v37 = vpop.permute.xlu1 %687 }
 0x125   :  { %v805_v11 = vadd.f32 %v804_v48, %v733_v44  ;;  %v534_v51 = vmax.f32 %v474_v54, %v1277_v60  ;;  %v478_v29 = vmul.f32 0.01, %v1291_v46  ;;  %v741_v30 = vmul.f32 %v668_v53, %v531_v63 }
 0x126   :  { %v771_v61 = vadd.f32 %v770_v23, %v734_v50  ;;  %v535_v41 = vmax.f32 %v475_v1, %v1280_v2  ;;  %v479_v55 = vmul.f32 0.01, %v1295_v56  ;;  %v742_v26 = vmul.f32 %v673_v42, %v532_v7 }
 0x127   :  { %v806_v38 = vadd.f32 %v805_v11, %v735_v57  ;;  %v536_v5 = vmax.f32 %v476_v9, %v1283_v20  ;;  %v743_v0 = vmul.f32 %v673_v42, %v533_v14  ;;  %v537_v31 = vmax.f32 %v477_v22, %v1286_v27 }
 0x128   :  { %v772_v10 = vadd.f32 %v771_v61, %v736_v28  ;;  %v744_v8 = vmul.f32 %v678_v25, %v534_v51  ;;  %v538_v60 = vmax.f32 %v478_v29, %v1291_v46  ;;  %v745_v19 = vmul.f32 %v678_v25, %v535_v41 }
 0x129   :  { %v807_v15 = vadd.f32 %v806_v38, %v737_v62  ;;  %v539_v35 = vmax.f32 %v479_v55, %v1295_v56  ;;  %v746_v12 = vmul.f32 %v683_v6, %v536_v5  ;;  %v747_v40 = vmul.f32 %v683_v6, %v537_v31 }
 0x12a   :  { %v773_v21 = vadd.f32 %v772_v10, %v738_v4  ;;  %v748_v20 = vmul.f32 %v688_v37, %v538_v60  ;;  %v927_v23 = vmov 1966171168   ;;  %v830_v57 = vlaneseq }
 0x12b   :  { %v808_v45 = vadd.f32 %v807_v15, %v739_v13  ;;  %v749_v43 = vmul.f32 %v688_v37, %v539_v35  ;;  %v828_v53 = vunpack.c.l.s4 %v927_v23 }
 0x12c   :  { %v774_v47 = vadd.f32 %v773_v21, %v740_v17  ;;  %v831_v54 = vshrl.u32 %v830_v57, 7  ;;  %vm844_vm2 = vcmp.lt.s32.totalorder %v830_v57, 256 }
 0x12d   :  { %v809_v33 = vadd.f32 %v808_v45, %v741_v30  ;;  %v829_v52 = vunpack.c.0.s8 %v828_v53 }
 0x12e   :  { %v775_v32 = vadd.f32 %v774_v47, %v742_v26 }
 0x12f   :  { %v810_v2 = vadd.f32 %v809_v33, %v743_v0  ;;  %v832_v38 = vsub.s32 %v829_v52, %v831_v54 }
 0x130   :  { %v776_v18 = vadd.f32 %v775_v32, %v744_v8 }
 0x131   :  { %v811_v3 = vadd.f32 %v810_v2, %v745_v19 }
 0x132   :  { %v777_v24 = vadd.f32 %v776_v18, %v746_v12 }
 0x133   :  { %v812_v16 = vadd.f32 %v811_v3, %v747_v40 }
 0x134   :  { %v778_v27 = vadd.f32 %v777_v24, %v748_v20 }
 0x135   :  { %v813_v44 = vadd.f32 %v812_v16, %v749_v43 }
 0x136   :  { %v779_v58 = vrot.slane %v778_v27, 4 }
 0x137   :  { %v814_v34 = vrot.slane %v813_v44, 4 }
 0x138   :  { %v780_v46 = vadd.f32 %v779_v58, %v778_v27 }
 0x139   :  { %v815_v48 = vadd.f32 %v814_v34, %v813_v44 }
 0x13a   :  { %v781_v50 = vrot.slane %v780_v46, 2 }
 0x13b   :  { %v816_v36 = vrot.slane %v815_v48, 2 }
 0x13c   :  { %v782_v39 = vadd.f32 %v781_v50, %v780_v46 }
 0x13d   :  { %v817_v56 = vadd.f32 %v816_v36, %v815_v48 }
 0x13e   :  { %v783_v49 = vrot.slane %v782_v39, 1 }
 0x13f   :  { %v818_v59 = vrot.slane %v817_v56, 1 }
 0x140   :  { %v784_v11 = vadd.f32 %v783_v49, %v782_v39 }
 0x141   :  { %v819_v28 = vadd.f32 %v818_v59, %v817_v56 }
 0x142   :  { %v820_v61 = vmul.f32 0.01, %v784_v11 }
 0x143   :  { %v821_v62 = vmul.f32 0.01, %v819_v28 }
 0x144   :  { %v822_v63 = vmax.f32 %v820_v61, %v784_v11 }
 0x145   :  { %v823_v1 = vmax.f32 %v821_v62, %v819_v28 }
 0x147   :  { %v826_v4 = vcombine.low %v822_v63, %v823_v1 }
 0x149   :  { %v833_v7 = vrot.slane %v826_v4, %v832_v38 }
 0x14b   :  { %v840_v9 = vrot.slane %v833_v7, %v832_v38 }
 0x14d   :  { %846 = vst.msk [vmem:[#allocation2] sm:$0x3] %vm844_vm2, %v840_v9 }
 0x14e   :  { %912 = shalt.err (!%p909_p4)
}
 0x14f   :  { %s913_s26 = scalar_lea.hbm %s1374_s3, 32 }
 0x150   :  { %p914_p5 = scmp.ne.s32.totalorder %s1374_s3, %s913_s26  ;;  %p917_p6 = scmp.lt.u32.totalorder %s913_s26, %s1374_s3 }
 0x152   :  { %p919_p7 = pnand %p917_p6, %p914_p5 }
 0x154   :  { %922 = shalt.err (!%p919_p7)
}
 0x155   :  { %856 = dma.vmem_to_hbm [thread:$0]  %s854_s22, 32, %s1374_s3, [#allocation3]  }
 0x156   :  { %923 = dma.done.wait [#allocation3], 32  }
 0x157   :  { %924 = vsyncadd [#allocation3], 4294967264 }
 0x158   :  { %860 = vsyncpa [#allocation3], 1 }

</bundles_post_ra>
